<compile_context>
chip_gen: v5e
topology: v5e:2x2
jax: 0.10.0
libtpu: 0.0.40
codegen_flags: <defaults>
</compile_context>

<pallas_src>
import jax
import jax.numpy as jnp
from jax.experimental import pallas as pl
from jax.experimental.pallas import tpu as pltpu

# Small, module-consistent sizes.
BATCH = 2
SEQ = 8
N_HEAD = 4
D_MODEL = 32
D_K = D_MODEL // N_HEAD
EPS = 1e-6


def _layernorm(y, gamma, beta):
    mu = jnp.mean(y, axis=-1, keepdims=True)
    var = jnp.mean((y - mu) ** 2, axis=-1, keepdims=True)  # biased var, like nn.LayerNorm
    return (y - mu) * jax.lax.rsqrt(var + EPS) * gamma + beta


def encoder_kernel(x_ref, wqkv_ref, bqkv_ref, wo_ref, wff_ref, vec_ref, o_ref):
    # x: full (B, S, D) activation; params are pre-packed per (head, batch).
    B, S, D = x_ref.shape
    HB = wqkv_ref.shape[0]          # H * B
    H = HB // B
    DK = wo_ref.shape[1]

    x3 = x_ref[...].astype(jnp.float32)            # (B, S, D)
    x2 = x3.reshape(B * S, D)                      # (B*S, D)

    # Replicate activations across heads; index k = h*B + b  ->  x[b].
    x_bh = jnp.concatenate([x3] * H, axis=0)       # (H*B, S, D)

    # --- Fused QKV projection: one batched MXU contraction ---------------
    qkv = jax.lax.dot_general(
        x_bh, wqkv_ref[...],
        dimension_numbers=(((2,), (1,)), ((0,), (0,))),
        preferred_element_type=jnp.float32) + bqkv_ref[...]      # (H*B, S, 3*DK)

    q = qkv[:, :, 0:DK]
    k = qkv[:, :, DK:2 * DK]
    v = qkv[:, :, 2 * DK:3 * DK]

    # --- Scaled dot-product attention, batched over (head, batch) --------
    scale = 1.0 / jnp.sqrt(jnp.float32(DK))
    s = jax.lax.dot_general(
        q, k, dimension_numbers=(((2,), (2,)), ((0,), (0,))),
        preferred_element_type=jnp.float32) * scale              # (H*B, S, S)
    s = s - jnp.max(s, axis=-1, keepdims=True)
    p = jnp.exp(s)
    p = p * pl.reciprocal(jnp.sum(p, axis=-1, keepdims=True), approx=True)

    ctx = jax.lax.dot_general(
        p, v, dimension_numbers=(((2,), (1,)), ((0,), (0,))),
        preferred_element_type=jnp.float32)                      # (H*B, S, DK)

    # Per-head output projection; summing heads == concat(heads) @ Wo.
    attn_parts = jax.lax.dot_general(
        ctx, wo_ref[...], dimension_numbers=(((2,), (1,)), ((0,), (0,))),
        preferred_element_type=jnp.float32)                      # (H*B, S, D)

    attn = attn_parts[0:B]
    for h in range(1, H):                                        # static, tiny
        attn = attn + attn_parts[h * B:(h + 1) * B]              # (B, S, D)

    vec = vec_ref[...].astype(jnp.float32)                       # (6, D)
    bo = vec[0:1, :]
    g1 = vec[1:2, :]
    b1 = vec[2:3, :]
    bff = vec[3:4, :]
    g2 = vec[4:5, :]
    b2 = vec[5:6, :]

    attn2 = attn.reshape(B * S, D) + bo

    # --- Residual + LayerNorm 1 ------------------------------------------
    x1 = _layernorm(x2 + attn2, g1, b1)

    # --- Feedforward (single Linear d_model -> d_model) ------------------
    ff = jnp.dot(x1, wff_ref[...], preferred_element_type=jnp.float32) + bff

    # --- Residual + LayerNorm 2 ------------------------------------------
    out = _layernorm(ff + x1, g2, b2)

    o_ref[...] = out.reshape(B, S, D).astype(o_ref.dtype)


def init_params(key):
    """Deterministic parameter init (PyTorch-Linear-style uniform bounds)."""
    ks = jax.random.split(key, 10)
    bound = 1.0 / jnp.sqrt(jnp.float32(D_MODEL))

    def lin(kw, kb):
        w = jax.random.uniform(kw, (D_MODEL, D_MODEL), jnp.float32, -bound, bound)
        b = jax.random.uniform(kb, (1, D_MODEL), jnp.float32, -bound, bound)
        return w, b

    wq, bq = lin(ks[0], ks[1])
    wk, bk = lin(ks[2], ks[3])
    wv, bv = lin(ks[4], ks[5])
    wo, bo = lin(ks[6], ks[7])
    wff, bff = lin(ks[8], ks[9])
    g1 = jnp.ones((1, D_MODEL), jnp.float32)
    b1 = jnp.zeros((1, D_MODEL), jnp.float32)
    g2 = jnp.ones((1, D_MODEL), jnp.float32)
    b2 = jnp.zeros((1, D_MODEL), jnp.float32)
    return (wq, bq, wk, bk, wv, bv, wo, bo, g1, b1, wff, bff, g2, b2)


def pack_params(params, batch):
    """One-time host-side packing into 5 kernel buffers (head-major, k = h*B + b)."""
    wq, bq, wk, bk, wv, bv, wo, bo, g1, b1, wff, bff, g2, b2 = params

    def per_head_w(w):   # (D, D) -> (H, D, D_K): columns of head h
        return w.reshape(D_MODEL, N_HEAD, D_K).transpose(1, 0, 2)

    def per_head_b(b):   # (1, D) -> (H, 1, D_K)
        return b.reshape(N_HEAD, D_K)[:, None, :]

    w_qkv_h = jnp.concatenate(
        [per_head_w(wq), per_head_w(wk), per_head_w(wv)], axis=-1)   # (H, D, 3*D_K)
    b_qkv_h = jnp.concatenate(
        [per_head_b(bq), per_head_b(bk), per_head_b(bv)], axis=-1)   # (H, 1, 3*D_K)
    wo_h = wo.reshape(N_HEAD, D_K, D_MODEL)                          # (H, D_K, D)

    # Expand to (H*B, ...) so the kernel's batched matmuls cover batch too.
    w_qkv_bh = jnp.repeat(w_qkv_h, batch, axis=0)                    # (H*B, D, 3*D_K)
    b_qkv_bh = jnp.repeat(b_qkv_h, batch, axis=0)                    # (H*B, 1, 3*D_K)
    wo_bh = jnp.repeat(wo_h, batch, axis=0)                          # (H*B, D_K, D)

    vecs = jnp.concatenate([bo, g1, b1, bff, g2, b2], axis=0)        # (6, D)
    return (w_qkv_bh, b_qkv_bh, wo_bh, wff, vecs)


@jax.jit
def encoder_forward(x, packed):
    B, S, D = x.shape
    w_qkv, b_qkv, w_out, w_ff, vecs = packed

    def full(arr):
        return pl.BlockSpec(arr.shape, lambda *_: (0,) * arr.ndim)

    return pl.pallas_call(
        encoder_kernel,
        out_shape=jax.ShapeDtypeStruct((B, S, D), x.dtype),
        grid=(1,),   # single step: whole problem is VMEM-resident
        in_specs=[full(x), full(w_qkv), full(b_qkv), full(w_out),
                  full(w_ff), full(vecs)],
        out_specs=full(x),
        compiler_params=pltpu.CompilerParams(
            dimension_semantics=("arbitrary",)),
    )(x, w_qkv, b_qkv, w_out, w_ff, vecs)


def encoder_reference(x, params):
    """Pure-JAX reference matching the PyTorch forward semantics."""
    wq, bq, wk, bk, wv, bv, wo, bo, g1, b1, wff, bff, g2, b2 = params
    q = x @ wq + bq
    k = x @ wk + bk
    v = x @ wv + bv

    def split(t):  # (B, S, D) -> (B, H, S, dk)
        B, S, _ = t.shape
        return t.reshape(B, S, N_HEAD, D_K).transpose(0, 2, 1, 3)

    qh, kh, vh = split(q), split(k), split(v)
    s = jnp.einsum("bhqd,bhkd->bhqk", qh, kh) / jnp.sqrt(jnp.float32(D_K))
    p = jax.nn.softmax(s, axis=-1)
    ctx = jnp.einsum("bhqk,bhkd->bhqd", p, vh)
    ctx = ctx.transpose(0, 2, 1, 3).reshape(x.shape)
    attn = ctx @ wo + bo

    def ln(y, g, b):
        mu = jnp.mean(y, axis=-1, keepdims=True)
        var = jnp.mean((y - mu) ** 2, axis=-1, keepdims=True)
        return (y - mu) / jnp.sqrt(var + EPS) * g + b

    x1 = ln(x + attn, g1, b1)
    ff = x1 @ wff + bff
    return ln(ff + x1, g2, b2)


if __name__ == "__main__":
    key = jax.random.PRNGKey(0)
    k_x, k_p = jax.random.split(key)
    x = jax.random.normal(k_x, (BATCH, SEQ, D_MODEL), jnp.float32)
    params = init_params(k_p)
    packed = pack_params(params, BATCH)   # one-time host-side packing

    out = encoder_forward(x, packed)
    out = jax.block_until_ready(out)

    ref = encoder_reference(x, params)
    assert out.shape == (BATCH, SEQ, D_MODEL)
    # Slightly relaxed tolerance because the softmax denominator uses the
    # hardware approximate reciprocal (pl.reciprocal(approx=True)).
    assert jnp.allclose(out, ref, atol=2e-3, rtol=2e-3), (
        "mismatch vs reference: max abs diff "
        f"{jnp.max(jnp.abs(out - ref))}")
    print("KERNEL_OK")
</pallas_src>

<mosaic_0001>
module attributes {stable_mosaic.version = 11 : i64} {
  func.func @encoder_kernel(%arg0: i32, %arg1: memref<2x8x32xf32, #tpu.memory_space<vmem>>, %arg2: memref<8x32x24xf32, #tpu.memory_space<vmem>>, %arg3: memref<8x1x24xf32, #tpu.memory_space<vmem>>, %arg4: memref<8x8x32xf32, #tpu.memory_space<vmem>>, %arg5: memref<32x32xf32, #tpu.memory_space<vmem>>, %arg6: memref<6x32xf32, #tpu.memory_space<vmem>>, %arg7: memref<2x8x32xf32, #tpu.memory_space<vmem>>) attributes {dimension_semantics = [#tpu.dimension_semantics<arbitrary>], iteration_bounds = array<i64: 1>, scalar_prefetch = 0 : i64, scratch_operands = 0 : i64, tpu.core_type = #tpu.core_type<tc>, window_params = [{pipeline_mode = #tpu.pipeline_mode<synchronous>, transform_indices = @transform_0, window_bounds = array<i64: 2, 8, 32>}, {pipeline_mode = #tpu.pipeline_mode<synchronous>, transform_indices = @transform_1, window_bounds = array<i64: 8, 32, 24>}, {pipeline_mode = #tpu.pipeline_mode<synchronous>, transform_indices = @transform_2, window_bounds = array<i64: 8, 1, 24>}, {pipeline_mode = #tpu.pipeline_mode<synchronous>, transform_indices = @transform_3, window_bounds = array<i64: 8, 8, 32>}, {pipeline_mode = #tpu.pipeline_mode<synchronous>, transform_indices = @transform_4, window_bounds = array<i64: 32, 32>}, {pipeline_mode = #tpu.pipeline_mode<synchronous>, transform_indices = @transform_5, window_bounds = array<i64: 6, 32>}, {pipeline_mode = #tpu.pipeline_mode<synchronous>, transform_indices = @transform_6, window_bounds = array<i64: 2, 8, 32>}]} {
    %c0 = arith.constant 0 : index
    %c0_0 = arith.constant 0 : index
    %c0_1 = arith.constant 0 : index
    %0 = vector.load %arg1[%c0, %c0_0, %c0_1] : memref<2x8x32xf32, #tpu.memory_space<vmem>>, vector<2x8x32xf32>
    %1 = vector.shape_cast %0 : vector<2x8x32xf32> to vector<16x32xf32>
    %2 = tpu.concatenate %0, %0, %0, %0 in 0 : vector<2x8x32xf32>, vector<2x8x32xf32>, vector<2x8x32xf32>, vector<2x8x32xf32> -> vector<8x8x32xf32>
    %c0_2 = arith.constant 0 : index
    %c0_3 = arith.constant 0 : index
    %c0_4 = arith.constant 0 : index
    %3 = vector.load %arg2[%c0_2, %c0_3, %c0_4] : memref<8x32x24xf32, #tpu.memory_space<vmem>>, vector<8x32x24xf32>
    %cst = arith.constant dense<0.000000e+00> : vector<8x8x24xf32>
    %4 = tpu.matmul %2, %3, %cst {dimension_numbers = #tpu.dot_dimension_numbers<[2], [1], [1], [2], [0, 0, 0, 1, 1, 2], [0], [0]>} : vector<8x8x32xf32>, vector<8x32x24xf32>, vector<8x8x24xf32> -> vector<8x8x24xf32>
    %c0_5 = arith.constant 0 : index
    %c0_6 = arith.constant 0 : index
    %c0_7 = arith.constant 0 : index
    %5 = vector.load %arg3[%c0_5, %c0_6, %c0_7] : memref<8x1x24xf32, #tpu.memory_space<vmem>>, vector<8x1x24xf32>
    %6 = vector.broadcast %5 : vector<8x1x24xf32> to vector<8x8x24xf32>
    %7 = arith.addf %4, %6 : vector<8x8x24xf32>
    %8 = vector.extract_strided_slice %7 {offsets = [0, 0, 0], sizes = [8, 8, 8], strides = [1, 1, 1]} : vector<8x8x24xf32> to vector<8x8x8xf32>
    %9 = vector.extract_strided_slice %7 {offsets = [0, 0, 8], sizes = [8, 8, 8], strides = [1, 1, 1]} : vector<8x8x24xf32> to vector<8x8x8xf32>
    %10 = vector.extract_strided_slice %7 {offsets = [0, 0, 16], sizes = [8, 8, 8], strides = [1, 1, 1]} : vector<8x8x24xf32> to vector<8x8x8xf32>
    %cst_8 = arith.constant 8.000000e+00 : f32
    %11 = math.sqrt %cst_8 : f32
    %cst_9 = arith.constant 1.000000e+00 : f32
    %12 = arith.divf %cst_9, %11 : f32
    %cst_10 = arith.constant dense<0.000000e+00> : vector<8x8x8xf32>
    %13 = tpu.matmul %8, %9, %cst_10 {dimension_numbers = #tpu.dot_dimension_numbers<[2], [2], [1], [1], [0, 0, 0, 1, 1, 1], [0], [0]>} : vector<8x8x8xf32>, vector<8x8x8xf32>, vector<8x8x8xf32> -> vector<8x8x8xf32>
    %14 = vector.broadcast %12 : f32 to vector<8x8x8xf32>
    %15 = arith.mulf %13, %14 : vector<8x8x8xf32>
    %cst_11 = arith.constant dense<0xFF800000> : vector<8x8xf32>
    %16 = vector.multi_reduction <maximumf>, %15, %cst_11 [2] : vector<8x8x8xf32> to vector<8x8xf32>
    %17 = vector.shape_cast %16 : vector<8x8xf32> to vector<8x8x1xf32>
    %18 = vector.broadcast %17 : vector<8x8x1xf32> to vector<8x8x8xf32>
    %19 = arith.subf %15, %18 : vector<8x8x8xf32>
    %20 = math.exp %19 : vector<8x8x8xf32>
    %cst_12 = arith.constant dense<0.000000e+00> : vector<8x8xf32>
    %21 = vector.multi_reduction <add>, %20, %cst_12 [2] : vector<8x8x8xf32> to vector<8x8xf32>
    %22 = vector.shape_cast %21 : vector<8x8xf32> to vector<8x8x1xf32>
    %23 = tpu.reciprocal %22 {approx = true} : vector<8x8x1xf32> -> vector<8x8x1xf32>
    %24 = vector.broadcast %23 : vector<8x8x1xf32> to vector<8x8x8xf32>
    %25 = arith.mulf %20, %24 : vector<8x8x8xf32>
    %cst_13 = arith.constant dense<0.000000e+00> : vector<8x8x8xf32>
    %26 = tpu.matmul %25, %10, %cst_13 {dimension_numbers = #tpu.dot_dimension_numbers<[2], [1], [1], [2], [0, 0, 0, 1, 1, 2], [0], [0]>} : vector<8x8x8xf32>, vector<8x8x8xf32>, vector<8x8x8xf32> -> vector<8x8x8xf32>
    %c0_14 = arith.constant 0 : index
    %c0_15 = arith.constant 0 : index
    %c0_16 = arith.constant 0 : index
    %27 = vector.load %arg4[%c0_14, %c0_15, %c0_16] : memref<8x8x32xf32, #tpu.memory_space<vmem>>, vector<8x8x32xf32>
    %cst_17 = arith.constant dense<0.000000e+00> : vector<8x8x32xf32>
    %28 = tpu.matmul %26, %27, %cst_17 {dimension_numbers = #tpu.dot_dimension_numbers<[2], [1], [1], [2], [0, 0, 0, 1, 1, 2], [0], [0]>} : vector<8x8x8xf32>, vector<8x8x32xf32>, vector<8x8x32xf32> -> vector<8x8x32xf32>
    %29 = vector.extract_strided_slice %28 {offsets = [0, 0, 0], sizes = [2, 8, 32], strides = [1, 1, 1]} : vector<8x8x32xf32> to vector<2x8x32xf32>
    %30 = vector.extract_strided_slice %28 {offsets = [2, 0, 0], sizes = [2, 8, 32], strides = [1, 1, 1]} : vector<8x8x32xf32> to vector<2x8x32xf32>
    %31 = arith.addf %29, %30 : vector<2x8x32xf32>
    %32 = vector.extract_strided_slice %28 {offsets = [4, 0, 0], sizes = [2, 8, 32], strides = [1, 1, 1]} : vector<8x8x32xf32> to vector<2x8x32xf32>
    %33 = arith.addf %31, %32 : vector<2x8x32xf32>
    %34 = vector.extract_strided_slice %28 {offsets = [6, 0, 0], sizes = [2, 8, 32], strides = [1, 1, 1]} : vector<8x8x32xf32> to vector<2x8x32xf32>
    %35 = arith.addf %33, %34 : vector<2x8x32xf32>
    %c0_18 = arith.constant 0 : index
    %c0_19 = arith.constant 0 : index
    %36 = vector.load %arg6[%c0_18, %c0_19] : memref<6x32xf32, #tpu.memory_space<vmem>>, vector<6x32xf32>
    %37 = vector.extract_strided_slice %36 {offsets = [0, 0], sizes = [1, 32], strides = [1, 1]} : vector<6x32xf32> to vector<1x32xf32>
    %38 = vector.extract_strided_slice %36 {offsets = [1, 0], sizes = [1, 32], strides = [1, 1]} : vector<6x32xf32> to vector<1x32xf32>
    %39 = vector.extract_strided_slice %36 {offsets = [2, 0], sizes = [1, 32], strides = [1, 1]} : vector<6x32xf32> to vector<1x32xf32>
    %40 = vector.extract_strided_slice %36 {offsets = [3, 0], sizes = [1, 32], strides = [1, 1]} : vector<6x32xf32> to vector<1x32xf32>
    %41 = vector.extract_strided_slice %36 {offsets = [4, 0], sizes = [1, 32], strides = [1, 1]} : vector<6x32xf32> to vector<1x32xf32>
    %42 = vector.extract_strided_slice %36 {offsets = [5, 0], sizes = [1, 32], strides = [1, 1]} : vector<6x32xf32> to vector<1x32xf32>
    %43 = vector.shape_cast %35 : vector<2x8x32xf32> to vector<16x32xf32>
    %44 = vector.broadcast %37 : vector<1x32xf32> to vector<16x32xf32>
    %45 = arith.addf %43, %44 : vector<16x32xf32>
    %46 = arith.addf %1, %45 : vector<16x32xf32>
    %cst_20 = arith.constant dense<0.000000e+00> : vector<16xf32>
    %47 = vector.multi_reduction <add>, %46, %cst_20 [1] : vector<16x32xf32> to vector<16xf32>
    %48 = vector.shape_cast %47 : vector<16xf32> to vector<16x1xf32>
    %cst_21 = arith.constant 3.200000e+01 : f32
    %49 = vector.broadcast %cst_21 : f32 to vector<16x1xf32>
    %50 = arith.divf %48, %49 : vector<16x1xf32>
    %51 = vector.broadcast %50 : vector<16x1xf32> to vector<16x32xf32>
    %52 = arith.subf %46, %51 : vector<16x32xf32>
    %53 = arith.mulf %52, %52 : vector<16x32xf32>
    %cst_22 = arith.constant dense<0.000000e+00> : vector<16xf32>
    %54 = vector.multi_reduction <add>, %53, %cst_22 [1] : vector<16x32xf32> to vector<16xf32>
    %55 = vector.shape_cast %54 : vector<16xf32> to vector<16x1xf32>
    %cst_23 = arith.constant 3.200000e+01 : f32
    %56 = vector.broadcast %cst_23 : f32 to vector<16x1xf32>
    %57 = arith.divf %55, %56 : vector<16x1xf32>
    %58 = vector.broadcast %50 : vector<16x1xf32> to vector<16x32xf32>
    %59 = arith.subf %46, %58 : vector<16x32xf32>
    %cst_24 = arith.constant 9.99999997E-7 : f32
    %60 = vector.broadcast %cst_24 : f32 to vector<16x1xf32>
    %61 = arith.addf %57, %60 : vector<16x1xf32>
    %62 = math.rsqrt %61 : vector<16x1xf32>
    %63 = vector.broadcast %62 : vector<16x1xf32> to vector<16x32xf32>
    %64 = arith.mulf %59, %63 : vector<16x32xf32>
    %65 = vector.broadcast %38 : vector<1x32xf32> to vector<16x32xf32>
    %66 = arith.mulf %64, %65 : vector<16x32xf32>
    %67 = vector.broadcast %39 : vector<1x32xf32> to vector<16x32xf32>
    %68 = arith.addf %66, %67 : vector<16x32xf32>
    %c0_25 = arith.constant 0 : index
    %c0_26 = arith.constant 0 : index
    %69 = vector.load %arg5[%c0_25, %c0_26] : memref<32x32xf32, #tpu.memory_space<vmem>>, vector<32x32xf32>
    %cst_27 = arith.constant dense<0.000000e+00> : vector<16x32xf32>
    %70 = tpu.matmul %68, %69, %cst_27 {dimension_numbers = #tpu.dot_dimension_numbers<[1], [0], [0], [1], [0, 0, 1, 1], [], []>} : vector<16x32xf32>, vector<32x32xf32>, vector<16x32xf32> -> vector<16x32xf32>
    %71 = vector.broadcast %40 : vector<1x32xf32> to vector<16x32xf32>
    %72 = arith.addf %70, %71 : vector<16x32xf32>
    %73 = arith.addf %72, %68 : vector<16x32xf32>
    %cst_28 = arith.constant dense<0.000000e+00> : vector<16xf32>
    %74 = vector.multi_reduction <add>, %73, %cst_28 [1] : vector<16x32xf32> to vector<16xf32>
    %75 = vector.shape_cast %74 : vector<16xf32> to vector<16x1xf32>
    %cst_29 = arith.constant 3.200000e+01 : f32
    %76 = vector.broadcast %cst_29 : f32 to vector<16x1xf32>
    %77 = arith.divf %75, %76 : vector<16x1xf32>
    %78 = vector.broadcast %77 : vector<16x1xf32> to vector<16x32xf32>
    %79 = arith.subf %73, %78 : vector<16x32xf32>
    %80 = arith.mulf %79, %79 : vector<16x32xf32>
    %cst_30 = arith.constant dense<0.000000e+00> : vector<16xf32>
    %81 = vector.multi_reduction <add>, %80, %cst_30 [1] : vector<16x32xf32> to vector<16xf32>
    %82 = vector.shape_cast %81 : vector<16xf32> to vector<16x1xf32>
    %cst_31 = arith.constant 3.200000e+01 : f32
    %83 = vector.broadcast %cst_31 : f32 to vector<16x1xf32>
    %84 = arith.divf %82, %83 : vector<16x1xf32>
    %85 = vector.broadcast %77 : vector<16x1xf32> to vector<16x32xf32>
    %86 = arith.subf %73, %85 : vector<16x32xf32>
    %cst_32 = arith.constant 9.99999997E-7 : f32
    %87 = vector.broadcast %cst_32 : f32 to vector<16x1xf32>
    %88 = arith.addf %84, %87 : vector<16x1xf32>
    %89 = math.rsqrt %88 : vector<16x1xf32>
    %90 = vector.broadcast %89 : vector<16x1xf32> to vector<16x32xf32>
    %91 = arith.mulf %86, %90 : vector<16x32xf32>
    %92 = vector.broadcast %41 : vector<1x32xf32> to vector<16x32xf32>
    %93 = arith.mulf %91, %92 : vector<16x32xf32>
    %94 = vector.broadcast %42 : vector<1x32xf32> to vector<16x32xf32>
    %95 = arith.addf %93, %94 : vector<16x32xf32>
    %96 = vector.shape_cast %95 : vector<16x32xf32> to vector<2x8x32xf32>
    %c0_33 = arith.constant 0 : index
    %c0_34 = arith.constant 0 : index
    %c0_35 = arith.constant 0 : index
    %97 = vector.load %arg7[%c0_33, %c0_34, %c0_35] : memref<2x8x32xf32, #tpu.memory_space<vmem>>, vector<2x8x32xf32>
    tpu.vector_store %arg7[%c0_33, %c0_34, %c0_35], %96 {strides = array<i32>} : memref<2x8x32xf32, #tpu.memory_space<vmem>>, vector<2x8x32xf32>,
    return
  }
  func.func @transform_0(%arg0: i32) -> (i32, i32, i32) {
    %c0_i32 = arith.constant 0 : i32
    %c0_i32_0 = arith.constant 0 : i32
    %c0_i32_1 = arith.constant 0 : i32
    %c0_i32_2 = arith.constant 0 : i32
    return %c0_i32, %c0_i32_0, %c0_i32_1 : i32, i32, i32
  }
  func.func @transform_1(%arg0: i32) -> (i32, i32, i32) {
    %c0_i32 = arith.constant 0 : i32
    %c0_i32_0 = arith.constant 0 : i32
    %c0_i32_1 = arith.constant 0 : i32
    %c0_i32_2 = arith.constant 0 : i32
    return %c0_i32, %c0_i32_0, %c0_i32_1 : i32, i32, i32
  }
  func.func @transform_2(%arg0: i32) -> (i32, i32, i32) {
    %c0_i32 = arith.constant 0 : i32
    %c0_i32_0 = arith.constant 0 : i32
    %c0_i32_1 = arith.constant 0 : i32
    %c0_i32_2 = arith.constant 0 : i32
    return %c0_i32, %c0_i32_0, %c0_i32_1 : i32, i32, i32
  }
  func.func @transform_3(%arg0: i32) -> (i32, i32, i32) {
    %c0_i32 = arith.constant 0 : i32
    %c0_i32_0 = arith.constant 0 : i32
    %c0_i32_1 = arith.constant 0 : i32
    %c0_i32_2 = arith.constant 0 : i32
    return %c0_i32, %c0_i32_0, %c0_i32_1 : i32, i32, i32
  }
  func.func @transform_4(%arg0: i32) -> (i32, i32) {
    %c0_i32 = arith.constant 0 : i32
    %c0_i32_0 = arith.constant 0 : i32
    %c0_i32_1 = arith.constant 0 : i32
    return %c0_i32, %c0_i32_0 : i32, i32
  }
  func.func @transform_5(%arg0: i32) -> (i32, i32) {
    %c0_i32 = arith.constant 0 : i32
    %c0_i32_0 = arith.constant 0 : i32
    %c0_i32_1 = arith.constant 0 : i32
    return %c0_i32, %c0_i32_0 : i32, i32
  }
  func.func @transform_6(%arg0: i32) -> (i32, i32, i32) {
    %c0_i32 = arith.constant 0 : i32
    %c0_i32_0 = arith.constant 0 : i32
    %c0_i32_1 = arith.constant 0 : i32
    %c0_i32_2 = arith.constant 0 : i32
    return %c0_i32, %c0_i32_0, %c0_i32_1 : i32, i32, i32
  }
}

</mosaic_0001>

<bundles_post_ra>
// kernel: encoder_forward.1
= control target key start
LH: loop header
LB: loop body
LE: loop exit
PB: predicated region body
PF: predicated region fallthrough
CT: control target
= control target key end

     0   :  { %vm90_vm0 = vcmask 261120   ;;  %s1658_s0 = inlined_call_operand.vmem [shape: f32[2,8,32], index: 0, kind: input, shape index: {}]   ;;  %s1659_s1 = inlined_call_operand.vmem [shape: f32[8,32,24], index: 1, kind: input, shape index: {}]   ;;  %s1660_s2 = inlined_call_operand.vmem [shape: f32[8,1,24], index: 2, kind: input, shape index: {}]   ;;  %s1661_s3 = inlined_call_operand.vmem [shape: f32[8,8,32], index: 3, kind: input, shape index: {}]   ;;  %s1662_s4 = inlined_call_operand.vmem [shape: f32[32,32], index: 4, kind: input, shape index: {}]   ;;  %s1663_s5 = inlined_call_operand.vmem [shape: f32[6,32], index: 5, kind: input, shape index: {}]   ;;  %s1664_s6 = inlined_call_operand.hbm [shape: f32[2,8,32], index: 6, kind: output, shape index: {}]  }
   0x1   :  { %v37_v0 = vld [vmem:[%s1659_s1 + $0x58] sm:$0xff]  ;;  %v36_v2 = vld [vmem:[%s1659_s1 + $0x50] sm:$0xff]  ;;  %v35_v4 = vld [vmem:[%s1659_s1 + $0x48] sm:$0xff] }
   0x2   :  { %v41_v1 = vld [vmem:[%s1659_s1 + $0x78] sm:$0xff]  ;;  %149 = vmatpush.msra.mxu2 %v37_v0  ;;  %v40_v3 = vld [vmem:[%s1659_s1 + $0x70] sm:$0xff]  ;;  %v39_v5 = vld [vmem:[%s1659_s1 + $0x68] sm:$0xff] }
   0x3   :  { %169 = vmatpush.msra.mxu3 %v41_v1  ;;  %v34_v6 = vld [vmem:[%s1659_s1 + $0x40] sm:$0xff]  ;;  %v1357_v9 = vld [vmem:[%s1658_s0 + $0x8] sm:$0xff]  ;;  %v29_v10 = vld [vmem:[%s1659_s1 + $0x18] sm:$0xff] }
   0x4   :  { %150 = vmatpush.msra.mxu2 %v36_v2  ;;  %v38_v7 = vld [vmem:[%s1659_s1 + $0x60] sm:$0xff]  ;;  %v53_v11 = vld [vmem:[%s1659_s1 + $0xd8] sm:$0xff]  ;;  %106 = vmatpush.msra.mxu1 %v29_v10  ;;  %v28_v13 = vld [vmem:[%s1659_s1 + $0x10] sm:$0xff] }
   0x5   :  { %170 = vmatpush.msra.mxu3 %v40_v3  ;;  %v1352_v8 = vld [vmem:[%s1658_s0] sm:$0xff]  ;;  %v57_v12 = vld [vmem:[%s1659_s1 + $0xf8] sm:$0xff]  ;;  %v52_v14 = vld [vmem:[%s1659_s1 + $0xd0] sm:$0xff] }
   0x6   :  { %151 = vmatpush.msra.mxu2 %v35_v4  ;;  %v56_v15 = vld [vmem:[%s1659_s1 + $0xf0] sm:$0xff]  ;;  %v45_v16 = vld [vmem:[%s1659_s1 + $0x98] sm:$0xff]  ;;  %v51_v17 = vld [vmem:[%s1659_s1 + $0xc8] sm:$0xff]  ;;  %107 = vmatpush.msra.mxu1 %v28_v13 }
   0x7   :  { %171 = vmatpush.msra.mxu3 %v39_v5  ;;  %v27_v18 = vld [vmem:[%s1659_s1 + $0x8] sm:$0xff]  ;;  %v44_v19 = vld [vmem:[%s1659_s1 + $0x90] sm:$0xff]  ;;  %v50_v21 = vld [vmem:[%s1659_s1 + $0xc0] sm:$0xff]  ;;  %189 = vmatpush.msra.mxu0 %v45_v16 }
   0x8   :  { %152 = vmatpush.msra.mxu2 %v34_v6  ;;  %v55_v20 = vld [vmem:[%s1659_s1 + $0xe8] sm:$0xff]  ;;  %v54_v22 = vld [vmem:[%s1659_s1 + $0xe0] sm:$0xff]  ;;  %108 = vmatpush.msra.mxu1 %v27_v18 }
   0x9   :  { %172 = vmatpush.msra.mxu3 %v38_v7  ;;  %1147 = vmatmul.msk.f32.vlgmr.msra.gmra.mxu2 %vm90_vm0, %v1352_v8  ;;  %v26_v23 = vld [vmem:[%s1659_s1] sm:$0xff]  ;;  %v43_v24 = vld [vmem:[%s1659_s1 + $0x88] sm:$0xff] }
   0xa   :  { %1148 = vmatmul.msk.f32.vlgmr.msra.gmra.mxu3 %vm90_vm0, %v1357_v9  ;;  %229 = vmatpush.msrb.mxu2 %v53_v11  ;;  %v42_v25 = vld [vmem:[%s1659_s1 + $0x80] sm:$0xff] }
   0xb   :  { %249 = vmatpush.msrb.mxu3 %v57_v12  ;;  %190 = vmatpush.msra.mxu0 %v44_v19 }
   0xc   :  { %230 = vmatpush.msrb.mxu2 %v52_v14  ;;  %109 = vmatpush.msra.mxu1 %v26_v23 }
   0xd   :  { %250 = vmatpush.msrb.mxu3 %v56_v15  ;;  %191 = vmatpush.msra.mxu0 %v43_v24 }
   0xe   :  { %231 = vmatpush.msrb.mxu2 %v51_v17 }
   0xf   :  { %251 = vmatpush.msrb.mxu3 %v55_v20 }
  0x10   :  { %11 = vsyncpa [#allocation3], 0  ;;  %232 = vmatpush.msrb.mxu2 %v50_v21  ;;  %v33_v26 = vld [vmem:[%s1659_s1 + $0x38] sm:$0xff]  ;;  %1145 = vmatmul.msk.f32.vlgmr.msra.gmra.mxu1 %vm90_vm0, %v1352_v8  ;;  %v32_v27 = vld [vmem:[%s1659_s1 + $0x30] sm:$0xff]  ;;  %s1284_s17 = smov 120   ;;  %vm260_vm1 = vcmask 64512  }
  0x11   :  { %252 = vmatpush.msrb.mxu3 %v54_v22  ;;  %1151 = vmatmul.msk.f32.vlgmr.msrb.gmra.mxu2 %vm90_vm0, %v1352_v8  ;;  %v31_v28 = vld [vmem:[%s1659_s1 + $0x28] sm:$0xff]  ;;  %v30_v29 = vld [vmem:[%s1659_s1 + $0x20] sm:$0xff]  ;;  %v49_v30 = vld [vmem:[%s1659_s1 + $0xb8] sm:$0xff]  ;;  %s1133_s30 = sshll.u32 %s1664_s6, 4  ;;  %s1288_s7 = smov 128   ;;  %s1134_s30 = int_to_ptr.hbm [resolvable:$true] %s1133_s30 }
  0x12   :  { %1152 = vmatmul.msk.f32.vlgmr.msrb.gmra.mxu3 %vm90_vm0, %v1357_v9  ;;  %192 = vmatpush.msra.mxu0 %v42_v25  ;;  %v48_v31 = vld [vmem:[%s1659_s1 + $0xb0] sm:$0xff]  ;;  %v47_v32 = vld [vmem:[%s1659_s1 + $0xa8] sm:$0xff]  ;;  %v46_v33 = vld [vmem:[%s1659_s1 + $0xa0] sm:$0xff]  ;;  %s1289_s8 = smov 8  }
  0x13   :  { %129 = vmatpush.msrb.mxu1 %v33_v26  ;;  %1149 = vmatmul.msk.f32.vlgmr.msra.gmra.mxu0 %vm90_vm0, %v1352_v8  ;;  %v1208_v34 = vld [vmem:[%s1660_s2 + $0x2] ss:$0 sm:$0xff]  ;;  %v1211_v39 = vld [vmem:[%s1660_s2 + $0x6] ss:$0 sm:$0xff]  ;;  %v1212_v40 = vld [vmem:[%s1660_s2 + $0x7] ss:$0 sm:$0xff] }
  0x14   :  { %v1209_v41 = vld [vmem:[%s1660_s2 + $0x3] ss:$0 sm:$0xff]  ;;  %v1213_v47 = vld [vmem:[%s1660_s2 + $0x1] ss:$0 sm:$0xff]  ;;  %v1214_v49 = vld [vmem:[%s1660_s2 + $0x4] ss:$0 sm:$0xff] }
  0x15   :  { %130 = vmatpush.msrb.mxu1 %v32_v27  ;;  %v1210_v50 = vld [vmem:[%s1660_s2] ss:$0 sm:$0xff]  ;;  %v1215_v55 = vld [vmem:[%s1660_s2 + $0x5] ss:$0 sm:$0xff]  ;;  %s1285_s2 = smov 112  }
  0x17   :  { %131 = vmatpush.msrb.mxu1 %v31_v28 }
  0x19   :  { %132 = vmatpush.msrb.mxu1 %v30_v29 }
  0x1a   :  { %1146 = vmatmul.msk.f32.vlgmr.msrb.gmra.mxu1 %vm90_vm0, %v1357_v9 }
  0x1b   :  { %209 = vmatpush.msra.mxu1 %v49_v30 }
  0x1d   :  { %210 = vmatpush.msra.mxu1 %v48_v31 }
  0x1f   :  { %211 = vmatpush.msra.mxu1 %v47_v32 }
  0x21   :  { %212 = vmatpush.msra.mxu1 %v46_v33 }
  0x22   :  { %1150 = vmatmul.msk.f32.vlgmr.msra.gmra.mxu1 %vm90_vm0, %v1357_v9 }
  0x8c   :  { %v154_v35 = vpop.f32.mrf.mxu2 }
  0x8d   :  { %v174_v36 = vpop.f32.mrf.mxu3  ;;  %v1450_v37 = vadd.f32 %v1208_v34, %v154_v35  ;;  %v111_v38 = vpop.f32.mrf.mxu1 }
  0x8e   :  { %v1466_v46 = vadd.f32 %v1209_v41, %v174_v36  ;;  %v1484_v54 = vadd.f32 %v1210_v50, %v111_v38 }
  0x8f   :  { %313 = vrot.lane.b32.xlu0 %v1450_v37, %s1284_s17 }
  0x90   :  { %v194_v51 = vpop.f32.mrf.mxu0 }
  0x91   :  { %v1482_v53 = vadd.f32 %v1214_v49, %v194_v51 }
  0x94   :  { %v234_v42 = vpop.f32.mrf.mxu2 }
  0x95   :  { %v254_v43 = vpop.f32.mrf.mxu3  ;;  %v1462_v44 = vadd.f32 %v1211_v39, %v234_v42 }
  0x96   :  { %v1464_v45 = vadd.f32 %v1212_v40, %v254_v43 }
  0x97   :  { %421 = vrot.lane.b32.xlu1 %v1462_v44, %s1284_s17  ;;  %v134_v48 = vpop.f32.mrf.mxu1  ;;  %340 = vrot.lane.b32.xlu0 %v1466_v46, %s1284_s17 }
  0x98   :  { %448 = vrot.lane.b32.xlu2 %v1464_v45, %s1284_s17  ;;  %v1480_v52 = vadd.f32 %v1213_v47, %v134_v48 }
  0x9a   :  { %v1203_v47 = vpack.i.bf16 %v1480_v52, %v1464_v45 }
  0x9f   :  { %258 = vrot.lane.b32.xlu1 %v1484_v54, %s1284_s17  ;;  %v214_v56 = vpop.f32.mrf.mxu1  ;;  %367 = vrot.lane.b32.xlu0 %v1482_v53, %s1284_s17 }
  0xa0   :  { %286 = vrot.lane.b32.xlu2 %v1480_v52, %s1284_s17  ;;  %v1492_v57 = vadd.f32 %v1215_v55, %v214_v56 }
  0xa7   :  { %394 = vrot.lane.b32.xlu1 %v1492_v57, %s1284_s17 }
  0xf2   :  { %v449_v58 = vpop.permute.xlu2 %448 }
  0xfa   :  { %v287_v59 = vpop.permute.xlu2 %286 }
  0xfb   :  { %1155 = vmatpush.xpose.msk.msrb.mxu1 %vm260_vm1, %v287_v59  ;;  %v1198_v59 = vpack.i.bf16 %v1484_v54, %v1462_v44 }
  0xfe   :  { %1156 = vmatmul.msk.f32.vlgmr.msrb.gmra.mxu1 %vm260_vm1, %v1480_v52  ;;  %v1193_v52 = vpack.i.bf16 %v1466_v46, %v1450_v37 }
 0x101   :  { %v314_v60 = vpop.permute.xlu0 %313 }
 0x102   :  { %1157 = vmatpush.xpose.msk.msra.mxu2 %vm260_vm1, %v314_v60 }
 0x105   :  { %1158 = vmatmul.msk.f32.vlgmr.msra.gmra.mxu2 %vm260_vm1, %v1450_v37 }
 0x109   :  { %v422_v61 = vpop.permute.xlu1 %421  ;;  %v341_v62 = vpop.permute.xlu0 %340 }
 0x10a   :  { %1165 = vmatpush.xpose.msk.msrb.mxu2 %vm260_vm1, %v422_v61  ;;  %1159 = vmatpush.xpose.msk.msra.mxu3 %vm260_vm1, %v341_v62 }
 0x10d   :  { %1166 = vmatmul.msk.f32.vlgmr.msrb.gmra.mxu2 %vm260_vm1, %v1462_v44  ;;  %1160 = vmatmul.msk.f32.vlgmr.msra.gmra.mxu3 %vm260_vm1, %v1466_v46 }
 0x10e   :  { %1167 = vmatpush.xpose.msk.msrb.mxu3 %vm260_vm1, %v449_v58 }
 0x111   :  { %v259_v63 = vpop.permute.xlu1 %258  ;;  %v368_v0 = vpop.permute.xlu0 %367 }
 0x112   :  { %1153 = vmatpush.xpose.msk.msrb.mxu0 %vm260_vm1, %v259_v63 }
 0x115   :  { %1154 = vmatmul.msk.f32.vlgmr.msrb.gmra.mxu0 %vm260_vm1, %v1484_v54  ;;  %1168 = vmatmul.msk.f32.vlgmr.msrb.gmra.mxu3 %vm260_vm1, %v1464_v45 }
 0x116   :  { %1161 = vmatpush.xpose.msk.msra.mxu0 %vm260_vm1, %v368_v0 }
 0x119   :  { %v395_v1 = vpop.permute.xlu1 %394 }
 0x11a   :  { %1163 = vmatpush.xpose.msk.msra.mxu1 %vm260_vm1, %v395_v1 }
 0x11d   :  { %1162 = vmatmul.msk.f32.vlgmr.msra.gmra.mxu0 %vm260_vm1, %v1482_v53  ;;  %1164 = vmatmul.msk.f32.vlgmr.msra.gmra.mxu1 %vm260_vm1, %v1492_v57 }
 0x17b   :  { %v309_v2 = vpop.f32.mrf.mxu1 }
 0x17c   :  { %v475_v3 = vmul.f32 0.35355338, %v309_v2 }
 0x17e   :  { %v485_v4 = vsel %vm260_vm1, %v475_v3, -inf }
 0x17f   :  { %486 = vmax.xlane.f32.xlu0 %v485_v4 }
 0x188   :  { %v336_v11 = vpop.f32.mrf.mxu2 }
 0x189   :  { %v476_v14 = vmul.f32 0.35355338, %v336_v11 }
 0x18b   :  { %v488_v17 = vsel %vm260_vm1, %v476_v14, -inf }
 0x190   :  { %v363_v5 = vpop.f32.mrf.mxu3  ;;  %v444_v19 = vpop.f32.mrf.mxu2 }
 0x191   :  { %v477_v6 = vmul.f32 0.35355338, %v363_v5  ;;  %v480_v21 = vmul.f32 0.35355338, %v444_v19 }
 0x192   :  { %v282_v7 = vpop.f32.mrf.mxu0 }
 0x193   :  { %v474_v10 = vmul.f32 0.35355338, %v282_v7  ;;  %v491_v12 = vsel %vm260_vm1, %v477_v6, -inf  ;;  %v500_v23 = vsel %vm260_vm1, %v480_v21, -inf }
 0x194   :  { %492 = vmax.xlane.f32.xlu0 %v491_v12 }
 0x195   :  { %v482_v13 = vsel %vm260_vm1, %v474_v10, -inf }
 0x196   :  { %483 = vmax.xlane.f32.xlu2 %v482_v13 }
 0x198   :  { %v471_v25 = vpop.f32.mrf.mxu3 }
 0x199   :  { %v481_v26 = vmul.f32 0.35355338, %v471_v25 }
 0x19a   :  { %v390_v15 = vpop.f32.mrf.mxu0  ;;  %v417_v20 = vpop.f32.mrf.mxu1 }
 0x19b   :  { %v1522_v16 = vmul.f32 0.35355338, %v390_v15  ;;  %v1527_v22 = vmul.f32 0.35355338, %v417_v20  ;;  %v503_v27 = vsel %vm260_vm1, %v481_v26, -inf }
 0x19d   :  { %v494_v18 = vsel %vm260_vm1, %v1522_v16, -inf  ;;  %v497_v24 = vsel %vm260_vm1, %v1527_v22, -inf }
 0x19e   :  { %489 = vmax.xlane.f32.xlu2 %v488_v17  ;;  %495 = vmax.xlane.f32.xlu1 %v494_v18 }
 0x1a6   :  { %501 = vmax.xlane.f32.xlu1 %v500_v23  ;;  %498 = vmax.xlane.f32.xlu2 %v497_v24 }
 0x1ae   :  { %504 = vmax.xlane.f32.xlu2 %v503_v27 }
 0x1f2   :  { %v487_v28 = vpop.xlane.xlu0 %486 }
 0x1f3   :  { %v507_v29 = vsub.f32 %v475_v3, %v487_v28 }
 0x1f5   :  { %v516_v30 = vmul.f32 1.442695, %v507_v29 }
 0x1f7   :  { %1216 = vpow2.f32 %v516_v30 }
 0x1fd   :  { %v1533_v31 = vpop.eup %1216 }
 0x1fe   :  { %v533_v32 = vsel %vm260_vm1, %v1533_v31, 0.0 }
 0x1ff   :  { %534 = vadd.xlane.f32.xlu2 %v533_v32 }
 0x207   :  { %v493_v33 = vpop.xlane.xlu0 %492 }
 0x208   :  { %v509_v36 = vsub.f32 %v477_v6, %v493_v33 }
 0x209   :  { %v484_v34 = vpop.xlane.xlu2 %483 }
 0x20a   :  { %v506_v35 = vsub.f32 %v474_v10, %v484_v34  ;;  %v520_v39 = vmul.f32 1.442695, %v509_v36 }
 0x20c   :  { %v514_v38 = vmul.f32 1.442695, %v506_v35 }
 0x20e   :  { %1218 = vpow2.f32 %v514_v38 }
 0x20f   :  { %1220 = vpow2.f32 %v520_v39 }
 0x211   :  { %v490_v40 = vpop.xlane.xlu2 %489  ;;  %v496_v45 = vpop.xlane.xlu1 %495 }
 0x212   :  { %v508_v41 = vsub.f32 %v476_v14, %v490_v40  ;;  %v510_v37 = vsub.f32 %v1522_v16, %v496_v45  ;;  %v784_v45 = vld [vmem:[%s1661_s3 + $0x30] sm:$0xff] }
 0x214   :  { %v1537_v42 = vpop.eup %1218  ;;  %v518_v43 = vmul.f32 1.442695, %v508_v41  ;;  %v522_v2 = vmul.f32 1.442695, %v510_v37 }
 0x215   :  { %v530_v48 = vsel %vm260_vm1, %v1537_v42, 0.0  ;;  %v1221_v49 = vpop.eup %1220 }
 0x216   :  { %1222 = vpow2.f32 %v518_v43  ;;  %531 = vadd.xlane.f32.xlu1 %v530_v48  ;;  %v539_v55 = vsel %vm260_vm1, %v1221_v49, 0.0  ;;  %v779_v43 = vld [vmem:[%s1661_s3 + $0x8] sm:$0xff] }
 0x217   :  { %1204 = vrot.lane.b32.xlu2 %v1203_v47, %s1285_s2 }
 0x219   :  { %v499_v56 = vpop.xlane.xlu2 %498  ;;  %v502_v58 = vpop.xlane.xlu1 %501 }
 0x21a   :  { %v512_v60 = vsub.f32 %v480_v21, %v502_v58  ;;  %v511_v3 = vsub.f32 %v1527_v22, %v499_v56 }
 0x21c   :  { %v1223_v50 = vpop.eup %1222  ;;  %v526_v61 = vmul.f32 1.442695, %v512_v60  ;;  %v524_v54 = vmul.f32 1.442695, %v511_v3  ;;  %v782_v60 = vld [vmem:[%s1661_s3 + $0x20] sm:$0xff] }
 0x21d   :  { %v536_v51 = vsel %vm260_vm1, %v1223_v50, 0.0 }
 0x21e   :  { %537 = vadd.xlane.f32.xlu0 %v536_v51  ;;  %540 = vadd.xlane.f32.xlu1 %v539_v55  ;;  %1224 = vpow2.f32 %v526_v61  ;;  %v780_v51 = vld [vmem:[%s1661_s3 + $0x10] sm:$0xff]  ;;  %v781_v55 = vld [vmem:[%s1661_s3 + $0x18] sm:$0xff]  ;;  %v783_v61 = vld [vmem:[%s1661_s3 + $0x28] sm:$0xff] }
 0x21f   :  { %674 = vrot.lane.b32.xlu2 %v1482_v53, %s1285_s2 }
 0x221   :  { %v505_v62 = vpop.xlane.xlu2 %504 }
 0x222   :  { %v513_v63 = vsub.f32 %v481_v26, %v505_v62 }
 0x224   :  { %v528_v0 = vmul.f32 1.442695, %v513_v63  ;;  %v1225_v53 = vpop.eup %1224 }
 0x225   :  { %v548_v1 = vsel %vm260_vm1, %v1225_v53, 0.0 }
 0x226   :  { %1226 = vpow2.f32 %v528_v0 }
 0x227   :  { %1228 = vpow2.f32 %v522_v2  ;;  %v1611_v2 = vld [vmem:[%s1663_s5] sm:$0x3f] }
 0x228   :  { %1230 = vpow2.f32 %v524_v54 }
 0x22c   :  { %v1227_v46 = vpop.eup %1226 }
 0x22d   :  { %v551_v44 = vsel %vm260_vm1, %v1227_v46, 0.0  ;;  %v1229_v4 = vpop.eup %1228 }
 0x22e   :  { %v542_v5 = vsel %vm260_vm1, %v1229_v4, 0.0  ;;  %v1559_v6 = vpop.eup %1230 }
 0x22f   :  { %v545_v7 = vsel %vm260_vm1, %v1559_v6, 0.0 }
 0x232   :  { %1194 = vrot.lane.b32.xlu0 %v1193_v52, %s1285_s2 }
 0x237   :  { %1199 = vrot.lane.b32.xlu1 %v1198_v59, %s1285_s2  ;;  %v785_v59 = vld [vmem:[%s1661_s3 + $0x38] sm:$0xff] }
 0x248   :  { %549 = vadd.xlane.f32.xlu2 %v548_v1 }
 0x250   :  { %552 = vadd.xlane.f32.xlu2 %v551_v44 }
 0x25c   :  { %543 = vadd.xlane.f32.xlu0 %v542_v5  ;;  %v977_v5 = vperm.slane %v1611_v2, 0 }
 0x261   :  { %546 = vadd.xlane.f32.xlu1 %v545_v7 }
 0x268   :  { %700 = vrot.lane.b32.xlu2 %v1492_v57, %s1285_s2 }
 0x272   :  { %v535_v10 = vpop.xlane.xlu2 %534 }
 0x273   :  { %1232 = vrcp.f32 %v535_v10 }
 0x279   :  { %v1233_v11 = vpop.eup %1232 }
 0x27a   :  { %v1205_v12 = vpop.permute.xlu2 %1204  ;;  %v563_v14 = vmul.f32 %v1233_v11, %v1533_v31 }
 0x27b   :  { %v1207_v13 = vunpack.i.h.bf16 %v1205_v12  ;;  %v1206_v24 = vunpack.i.l.bf16 %v1205_v12 }
 0x27d   :  { %617 = vmatpush.msrb.mxu1 %v1207_v13 }
 0x27e   :  { %1170 = vmatmul.msk.f32.vlgmr.msrb.gmra.mxu1 %vm260_vm1, %v563_v14 }
 0x282   :  { %v675_v30 = vpop.permute.xlu2 %674 }
 0x289   :  { %v532_v15 = vpop.xlane.xlu1 %531 }
 0x291   :  { %v538_v16 = vpop.xlane.xlu0 %537  ;;  %v541_v17 = vpop.xlane.xlu1 %540 }
 0x292   :  { %1234 = vrcp.f32 %v538_v16 }
 0x293   :  { %1236 = vrcp.f32 %v541_v17 }
 0x294   :  { %1238 = vrcp.f32 %v532_v15 }
 0x298   :  { %v1235_v18 = vpop.eup %1234 }
 0x299   :  { %v1237_v19 = vpop.eup %1236  ;;  %v564_v22 = vmul.f32 %v1235_v18, %v1223_v50  ;;  %v778_v50 = vld [vmem:[%s1661_s3] sm:$0xff] }
 0x29a   :  { %v565_v23 = vmul.f32 %v1237_v19, %v1221_v49  ;;  %v1239_v25 = vpop.eup %1238 }
 0x29b   :  { %v562_v29 = vmul.f32 %v1239_v25, %v1537_v42 }
 0x2a4   :  { %v1195_v20 = vpop.permute.xlu0 %1194 }
 0x2a5   :  { %v1197_v57 = vunpack.i.h.bf16 %v1195_v20  ;;  %v1196_v21 = vunpack.i.l.bf16 %v1195_v20 }
 0x2a7   :  { %643 = vmatpush.msra.mxu2 %v1196_v21  ;;  %669 = vmatpush.msra.mxu3 %v1197_v57  ;;  %v1286_v57 = vmov 32.0  }
 0x2a8   :  { %1171 = vmatmul.msk.f32.vlgmr.msra.gmra.mxu2 %vm260_vm1, %v564_v22  ;;  %1172 = vmatmul.msk.f32.vlgmr.msra.gmra.mxu3 %vm260_vm1, %v565_v23 }
 0x2a9   :  { %773 = vmatpush.msrb.mxu3 %v1206_v24  ;;  %v1200_v26 = vpop.permute.xlu1 %1199 }
 0x2aa   :  { %v1202_v27 = vunpack.i.h.bf16 %v1200_v26  ;;  %v1201_v28 = vunpack.i.l.bf16 %v1200_v26 }
 0x2ab   :  { %873 = vmatpush.msra.mxu3 %v781_v55 }
 0x2ac   :  { %591 = vmatpush.msrb.mxu0 %v1202_v27  ;;  %747 = vmatpush.msrb.mxu2 %v1201_v28 }
 0x2ad   :  { %1169 = vmatmul.msk.f32.vlgmr.msrb.gmra.mxu0 %vm260_vm1, %v562_v29 }
 0x2ae   :  { %695 = vmatpush.msra.mxu0 %v675_v30  ;;  %850 = vmatpush.msra.mxu2 %v780_v51 }
 0x2b0   :  { %804 = vmatpush.msrb.mxu0 %v778_v50 }
 0x2bb   :  { %v550_v31 = vpop.xlane.xlu2 %549 }
 0x2bc   :  { %1240 = vrcp.f32 %v550_v31 }
 0x2c2   :  { %v1241_v32 = vpop.eup %1240 }
 0x2c3   :  { %v568_v33 = vmul.f32 %v1241_v32, %v1225_v53  ;;  %v553_v34 = vpop.xlane.xlu2 %552 }
 0x2c4   :  { %1242 = vrcp.f32 %v553_v34 }
 0x2c5   :  { %1175 = vmatmul.msk.f32.vlgmr.msrb.gmra.mxu2 %vm260_vm1, %v568_v33 }
 0x2c6   :  { %942 = vmatpush.msrb.mxu2 %v784_v45 }
 0x2ca   :  { %v1243_v35 = vpop.eup %1242 }
 0x2cb   :  { %v569_v36 = vmul.f32 %v1243_v35, %v1227_v46  ;;  %v701_v38 = vpop.permute.xlu2 %700  ;;  %v1042_v35 = vld [vmem:[%s1662_s4 + $0x18] sm:$0xff] }
 0x2cc   :  { %721 = vmatpush.msra.mxu1 %v701_v38  ;;  %v1040_v38 = vld [vmem:[%s1662_s4 + $0x8] sm:$0xff] }
 0x2cd   :  { %1176 = vmatmul.msk.f32.vlgmr.msrb.gmra.mxu3 %vm260_vm1, %v569_v36  ;;  %v1041_v36 = vld [vmem:[%s1662_s4 + $0x10] sm:$0xff] }
 0x2ce   :  { %827 = vmatpush.msrb.mxu1 %v779_v43  ;;  %965 = vmatpush.msrb.mxu3 %v785_v59 }
 0x2cf   :  { %v544_v39 = vpop.xlane.xlu0 %543 }
 0x2d0   :  { %1244 = vrcp.f32 %v544_v39  ;;  %v1039_v39 = vld [vmem:[%s1662_s4] sm:$0xff]  ;;  %s1287_s4 = smov [#allocation2]  }
 0x2d1   :  { %s1131_s28 = sshll.u32 %s1287_s4, 4  ;;  %s1132_s28 = int_to_ptr.vmem [resolvable:$true] %s1131_s28 }
 0x2d4   :  { %v547_v40 = vpop.xlane.xlu1 %546 }
 0x2d5   :  { %1246 = vrcp.f32 %v547_v40 }
 0x2d6   :  { %v1245_v41 = vpop.eup %1244  ;;  %1248 = vrcp.f32 %v1286_v57 }
 0x2d7   :  { %v566_v42 = vmul.f32 %v1245_v41, %v1229_v4 }
 0x2d9   :  { %1173 = vmatmul.msk.f32.vlgmr.msra.gmra.mxu0 %vm260_vm1, %v566_v42 }
 0x2da   :  { %896 = vmatpush.msra.mxu0 %v782_v60  ;;  %v1033_v60 = vperm.slane %v1611_v2, 1 }
 0x2db   :  { %v1247_v47 = vpop.eup %1246 }
 0x2dc   :  { %v567_v48 = vmul.f32 %v1247_v47, %v1559_v6  ;;  %v1249_v21 = vpop.eup %1248 }
 0x2dd   :  { %v989_v22 = vmul.f32 32.0, %v1249_v21  ;;  %vm993_vm2 = vweird.f32 %v1249_v21 }
 0x2de   :  { %1174 = vmatmul.msk.f32.vlgmr.msra.gmra.mxu1 %vm260_vm1, %v567_v48 }
 0x2df   :  { %919 = vmatpush.msra.mxu1 %v783_v61  ;;  %v990_v23 = vsub.f32 1.0, %v989_v22 }
 0x2e1   :  { %v991_v24 = vmul.f32 %v1249_v21, %v990_v23 }
 0x2e3   :  { %v992_v25 = vadd.f32 %v1249_v21, %v991_v24 }
 0x2e5   :  { %v1618_v26 = vsel %vm993_vm2, %v1249_v21, %v992_v25 }
 0x2fb   :  { %v619_v49 = vpop.f32.mrf.mxu1 }
 0x2fc   :  { %1178 = vmatmul.msk.f32.vlgmr.msrb.gmra.mxu1 %vm260_vm1, %v619_v49 }
 0x32a   :  { %v593_v52 = vpop.f32.mrf.mxu0 }
 0x32b   :  { %v645_v56 = vpop.f32.mrf.mxu2  ;;  %v671_v58 = vpop.f32.mrf.mxu3  ;;  %1177 = vmatmul.msk.f32.vlgmr.msrb.gmra.mxu0 %vm260_vm1, %v593_v52 }
 0x32c   :  { %1179 = vmatmul.msk.f32.vlgmr.msra.gmra.mxu2 %vm260_vm1, %v645_v56  ;;  %1180 = vmatmul.msk.f32.vlgmr.msra.gmra.mxu3 %vm260_vm1, %v671_v58 }
 0x32d   :  { %1062 = vmatpush.msrb.mxu0 %v1042_v35 }
 0x32f   :  { %1063 = vmatpush.msrb.mxu0 %v1041_v36 }
 0x331   :  { %1064 = vmatpush.msrb.mxu0 %v1040_v38 }
 0x333   :  { %1065 = vmatpush.msrb.mxu0 %v1039_v39  ;;  %v1119_v39 = vperm.slane %v1611_v2, 4 }
 0x348   :  { %v749_v62 = vpop.f32.mrf.mxu2 }
 0x349   :  { %1183 = vmatmul.msk.f32.vlgmr.msrb.gmra.mxu2 %vm260_vm1, %v749_v62 }
 0x350   :  { %v775_v63 = vpop.f32.mrf.mxu3 }
 0x351   :  { %1184 = vmatmul.msk.f32.vlgmr.msrb.gmra.mxu3 %vm260_vm1, %v775_v63 }
 0x356   :  { %v697_v0 = vpop.f32.mrf.mxu0 }
 0x357   :  { %1181 = vmatmul.msk.f32.vlgmr.msra.gmra.mxu0 %vm260_vm1, %v697_v0 }
 0x35b   :  { %v723_v53 = vpop.f32.mrf.mxu1 }
 0x35c   :  { %1182 = vmatmul.msk.f32.vlgmr.msra.gmra.mxu1 %vm260_vm1, %v723_v53  ;;  %v1036_v53 = vperm.slane %v1611_v2, 2 }
 0x379   :  { %v829_v46 = vpop.f32.mrf.mxu1 }
 0x3a8   :  { %v806_v1 = vpop.f32.mrf.mxu0 }
 0x3af   :  { %v852_v37 = vpop.f32.mrf.mxu2  ;;  %v875_v44 = vpop.f32.mrf.mxu3 }
 0x3b0   :  { %v970_v3 = vadd.f32 %v852_v37, %v806_v1  ;;  %v971_v10 = vadd.f32 %v875_v44, %v829_v46 }
 0x3cc   :  { %v944_v6 = vpop.f32.mrf.mxu2 }
 0x3d4   :  { %v898_v54 = vpop.f32.mrf.mxu0  ;;  %v967_v14 = vpop.f32.mrf.mxu3 }
 0x3d5   :  { %v972_v4 = vadd.f32 %v970_v3, %v898_v54 }
 0x3d7   :  { %v974_v7 = vadd.f32 %v972_v4, %v944_v6 }
 0x3d9   :  { %v921_v11 = vpop.f32.mrf.mxu1  ;;  %v978_v12 = vadd.f32 %v977_v5, %v974_v7 }
 0x3da   :  { %v973_v13 = vadd.f32 %v971_v10, %v921_v11 }
 0x3db   :  { %v980_v15 = vadd.f32 %v978_v12, %v1352_v8 }
 0x3dc   :  { %v975_v16 = vadd.f32 %v973_v13, %v967_v14 }
 0x3dd   :  { %v982_v17 = vsel %vm90_vm0, %v980_v15, 0.0 }
 0x3de   :  { %983 = vadd.xlane.f32.xlu0 %v982_v17  ;;  %v979_v18 = vadd.f32 %v977_v5, %v975_v16  ;;  %v1043_v5 = vperm.slane %v1611_v2, 3 }
 0x3e0   :  { %v981_v19 = vadd.f32 %v979_v18, %v1357_v9 }
 0x3e2   :  { %v985_v20 = vsel %vm90_vm0, %v981_v19, 0.0 }
 0x3e3   :  { %986 = vadd.xlane.f32.xlu2 %v985_v20 }
 0x451   :  { %v984_v8 = vpop.xlane.xlu0 %983 }
 0x452   :  { %v995_v27 = vmul.f32 %v1618_v26, %v984_v8 }
 0x454   :  { %v997_v28 = vsub.f32 %v980_v15, %v995_v27 }
 0x456   :  { %v987_v29 = vpop.xlane.xlu2 %986  ;;  %v999_v30 = vmul.f32 %v997_v28, %v997_v28 }
 0x457   :  { %v996_v9 = vmul.f32 %v1618_v26, %v987_v29 }
 0x458   :  { %v1001_v31 = vsel %vm90_vm0, %v999_v30, 0.0 }
 0x459   :  { %v998_v32 = vsub.f32 %v981_v19, %v996_v9  ;;  %1002 = vadd.xlane.f32.xlu0 %v1001_v31 }
 0x45b   :  { %v1000_v33 = vmul.f32 %v998_v32, %v998_v32 }
 0x45d   :  { %v1004_v34 = vsel %vm90_vm0, %v1000_v33, 0.0 }
 0x45e   :  { %1005 = vadd.xlane.f32.xlu1 %v1004_v34 }
 0x4cc   :  { %v1003_v40 = vpop.xlane.xlu0 %1002 }
 0x4cd   :  { %v1007_v41 = vmul.f32 %v1003_v40, %v1618_v26 }
 0x4cf   :  { %v1009_v42 = vadd.f32 1e-06, %v1007_v41 }
 0x4d1   :  { %1250 = vrsqrt.f32 %v1009_v42  ;;  %v1006_v43 = vpop.xlane.xlu1 %1005  ;;  %vm1017_vm4 = vweird.f32 %v1009_v42 }
 0x4d2   :  { %v1008_v47 = vmul.f32 %v1006_v43, %v1618_v26 }
 0x4d4   :  { %v1010_v48 = vadd.f32 1e-06, %v1008_v47 }
 0x4d6   :  { %1252 = vrsqrt.f32 %v1010_v48  ;;  %vm1027_vm7 = vweird.f32 %v1010_v48 }
 0x4d7   :  { %v1251_v49 = vpop.eup %1250 }
 0x4d8   :  { %v1012_v50 = vmul.f32 %v1251_v49, %v1009_v42  ;;  %vm1018_vm3 = vweird.f32 %v1251_v49 }
 0x4d9   :  { %vm1019_vm5 = vmor %vm1017_vm4, %vm1018_vm3 }
 0x4da   :  { %v1013_v51 = vmul.f32 %v1251_v49, %v1012_v50 }
 0x4dc   :  { %v1253_v55 = vpop.eup %1252  ;;  %v1014_v45 = vmul.f32 0.5, %v1013_v51 }
 0x4dd   :  { %v1022_v52 = vmul.f32 %v1253_v55, %v1010_v48  ;;  %vm1028_vm6 = vweird.f32 %v1253_v55 }
 0x4de   :  { %v1015_v56 = vsub.f32 1.5, %v1014_v45  ;;  %vm1029_vm8 = vmor %vm1027_vm7, %vm1028_vm6 }
 0x4df   :  { %v1023_v58 = vmul.f32 %v1253_v55, %v1022_v52 }
 0x4e0   :  { %v1016_v59 = vmul.f32 %v1251_v49, %v1015_v56 }
 0x4e1   :  { %v1024_v61 = vmul.f32 0.5, %v1023_v58 }
 0x4e2   :  { %v1020_v62 = vsel %vm1019_vm5, %v1251_v49, %v1016_v59 }
 0x4e3   :  { %v1031_v63 = vmul.f32 %v1020_v62, %v997_v28  ;;  %v1025_v0 = vsub.f32 1.5, %v1024_v61 }
 0x4e5   :  { %v1034_v1 = vmul.f32 %v1033_v60, %v1031_v63  ;;  %v1026_v37 = vmul.f32 %v1253_v55, %v1025_v0 }
 0x4e7   :  { %v1030_v46 = vsel %vm1029_vm8, %v1253_v55, %v1026_v37  ;;  %v1037_v3 = vadd.f32 %v1036_v53, %v1034_v1 }
 0x4e8   :  { %v1032_v44 = vmul.f32 %v1030_v46, %v998_v32 }
 0x4e9   :  { %1185 = vmatmul.msk.f32.vlgmr.msrb.gmra.mxu0 %vm90_vm0, %v1037_v3 }
 0x4ea   :  { %v1035_v54 = vmul.f32 %v1033_v60, %v1032_v44 }
 0x4ec   :  { %v1038_v4 = vadd.f32 %v1036_v53, %v1035_v54 }
 0x4f1   :  { %1186 = vmatmul.msk.f32.gmra.mxu0 %vm90_vm0, %v1038_v4 }
 0x566   :  { %v1067_v6 = vpop.f32.mrf.mxu0 }
 0x567   :  { %v1068_v7 = vadd.f32 %v1067_v6, %v1043_v5 }
 0x569   :  { %v1073_v10 = vadd.f32 %v1068_v7, %v1037_v3 }
 0x56b   :  { %v1075_v11 = vsel %vm90_vm0, %v1073_v10, 0.0 }
 0x56c   :  { %1076 = vadd.xlane.f32.xlu0 %v1075_v11 }
 0x56e   :  { %v1070_v12 = vpop.f32.mrf.mxu0 }
 0x56f   :  { %v1071_v13 = vadd.f32 %v1070_v12, %v1043_v5 }
 0x571   :  { %v1074_v14 = vadd.f32 %v1071_v13, %v1038_v4 }
 0x573   :  { %v1078_v15 = vsel %vm90_vm0, %v1074_v14, 0.0 }
 0x574   :  { %1079 = vadd.xlane.f32.xlu1 %v1078_v15 }
 0x5df   :  { %v1077_v16 = vpop.xlane.xlu0 %1076 }
 0x5e0   :  { %v1081_v17 = vmul.f32 %v1077_v16, %v1618_v26 }
 0x5e2   :  { %v1083_v18 = vsub.f32 %v1073_v10, %v1081_v17 }
 0x5e4   :  { %v1085_v19 = vmul.f32 %v1083_v18, %v1083_v18 }
 0x5e6   :  { %v1087_v20 = vsel %vm90_vm0, %v1085_v19, 0.0 }
 0x5e7   :  { %v1080_v57 = vpop.xlane.xlu1 %1079  ;;  %1088 = vadd.xlane.f32.xlu0 %v1087_v20 }
 0x5e8   :  { %v1082_v21 = vmul.f32 %v1080_v57, %v1618_v26 }
 0x5ea   :  { %v1084_v22 = vsub.f32 %v1074_v14, %v1082_v21 }
 0x5ec   :  { %v1086_v23 = vmul.f32 %v1084_v22, %v1084_v22 }
 0x5ee   :  { %v1090_v24 = vsel %vm90_vm0, %v1086_v23, 0.0 }
 0x5ef   :  { %1091 = vadd.xlane.f32.xlu1 %v1090_v24 }
 0x65a   :  { %v1089_v25 = vpop.xlane.xlu0 %1088 }
 0x65b   :  { %v1093_v8 = vmul.f32 %v1089_v25, %v1618_v26 }
 0x65d   :  { %v1095_v27 = vadd.f32 1e-06, %v1093_v8 }
 0x65f   :  { %1254 = vrsqrt.f32 %v1095_v27  ;;  %vm1103_vm10 = vweird.f32 %v1095_v27 }
 0x662   :  { %v1092_v28 = vpop.xlane.xlu1 %1091 }
 0x663   :  { %v1094_v29 = vmul.f32 %v1092_v28, %v1618_v26  ;;  %v1122_v26 = vperm.slane %v1611_v2, 5 }
 0x665   :  { %v1255_v30 = vpop.eup %1254  ;;  %v1096_v9 = vadd.f32 1e-06, %v1094_v29 }
 0x666   :  { %v1098_v31 = vmul.f32 %v1255_v30, %v1095_v27  ;;  %vm1104_vm9 = vweird.f32 %v1255_v30 }
 0x667   :  { %1256 = vrsqrt.f32 %v1096_v9  ;;  %vm1105_vm11 = vmor %vm1103_vm10, %vm1104_vm9  ;;  %vm1113_vm13 = vweird.f32 %v1096_v9 }
 0x668   :  { %v1099_v32 = vmul.f32 %v1255_v30, %v1098_v31 }
 0x66a   :  { %v1100_v33 = vmul.f32 0.5, %v1099_v32 }
 0x66c   :  { %v1101_v34 = vsub.f32 1.5, %v1100_v33 }
 0x66d   :  { %v1257_v35 = vpop.eup %1256 }
 0x66e   :  { %v1102_v36 = vmul.f32 %v1255_v30, %v1101_v34  ;;  %v1108_v38 = vmul.f32 %v1257_v35, %v1096_v9  ;;  %vm1114_vm12 = vweird.f32 %v1257_v35 }
 0x66f   :  { %vm1115_vm14 = vmor %vm1113_vm13, %vm1114_vm12 }
 0x670   :  { %v1106_v40 = vsel %vm1105_vm11, %v1255_v30, %v1102_v36  ;;  %v1109_v41 = vmul.f32 %v1257_v35, %v1108_v38 }
 0x671   :  { %v1117_v42 = vmul.f32 %v1106_v40, %v1083_v18 }
 0x672   :  { %v1110_v43 = vmul.f32 0.5, %v1109_v41 }
 0x673   :  { %v1120_v47 = vmul.f32 %v1119_v39, %v1117_v42 }
 0x674   :  { %v1111_v48 = vsub.f32 1.5, %v1110_v43 }
 0x675   :  { %v1123_v49 = vadd.f32 %v1122_v26, %v1120_v47 }
 0x676   :  { %v1112_v50 = vmul.f32 %v1257_v35, %v1111_v48 }
 0x677   :  { %1125 = vst.msk [vmem:[#allocation2] sm:$0xff] %vm90_vm0, %v1123_v49 }
 0x678   :  { %v1116_v51 = vsel %vm1115_vm14, %v1257_v35, %v1112_v50 }
 0x679   :  { %v1118_v55 = vmul.f32 %v1116_v51, %v1084_v22 }
 0x67b   :  { %v1121_v45 = vmul.f32 %v1119_v39, %v1118_v55 }
 0x67d   :  { %v1124_v2 = vadd.f32 %v1122_v26, %v1121_v45 }
 0x67f   :  { %1126 = vst.msk [vmem:[#allocation2 + $0x8] sm:$0xff] %vm90_vm0, %v1124_v2 }
 0x680   :  { %1139 = dma.vmem_to_hbm [thread:$0]  %s1132_s28, 256, %s1134_s30, [#allocation3], %s1288_s7, %s1288_s7, %s1289_s8  }
 0x681   :  { %1282 = dma.done.wait [#allocation3], 256  }
 0x682   :  { %1283 = vsyncadd [#allocation3], 4294967040 }
 0x683   :  { %1144 = vsyncpa [#allocation3], 1 }

</bundles_post_ra>
